<compile_context>
chip_gen: v5e
topology: v5e:2x2
jax: 0.10.0
libtpu: 0.0.40
codegen_flags: <defaults>
</compile_context>

<pallas_src>
import math
import numpy as np
import jax
import jax.numpy as jnp
from jax.experimental import pallas as pl
from jax.experimental.pallas import tpu as pltpu


def _round_up(x, m):
    return ((x + m - 1) // m) * m


def _cdiv(a, b):
    return (a + b - 1) // b


def _sublane_multiple(dtype):
    return {4: 8, 2: 16, 1: 32}.get(np.dtype(dtype).itemsize, 8)


def _vmem_budget_bytes():
    """VMEM request with headroom: ~0.7 * physical, capped at 96 MiB.

    v7x: 0.7 * 64 MiB ~= 45 MiB (never over-requests the 64 MiB/TC physical).
    v5e/v6e: capped at 96 MiB of the 128 MiB physical.
    """
    phys = 64 * 1024 * 1024              # conservative fallback (v7x per-TC)
    try:
        info = pltpu.get_tpu_info()
        phys = int(getattr(info, "vmem_capacity_bytes", phys))
    except Exception:
        pass
    return int(min(phys * 0.70, 96 * 1024 * 1024))


# --------------------------------------------------------------------------- #
# Kernel (shared by both formulations)
# --------------------------------------------------------------------------- #
def _mvlinear_tile_kernel(x_ref, w_ref, b_ref, o_ref):
    # x_ref: (rb, K)  streaming activations (bf16 or f32)
    # w_ref: (K, cb)  weight tile, resident across the inner row loop
    # b_ref: (1, cb)  f32 bias row (scalar-blade embedding)
    # o_ref: (rb, cb) lane-dense output tile (cb % 128 == 0)
    acc = jnp.dot(x_ref[...], w_ref[...], preferred_element_type=jnp.float32)
    # bias add in f32 (v5e VPU has no bf16 ALU); single cast at the store.
    o_ref[...] = (acc + b_ref[...]).astype(o_ref.dtype)


# --------------------------------------------------------------------------- #
# Mode selection + hoisted parameter preprocessing (once per weight update)
# --------------------------------------------------------------------------- #
def mvlinear_choose_mode(in_features, out_features, n_blades):
    """per_blade removes the block-diagonal structural zeros (~(D-1)/D of MXU
    work and weight traffic) once the layer is big enough that padding the
    per-blade N to 128 output lanes does not dominate store traffic."""
    if in_features * n_blades >= 256 and out_features >= 64:
        return "per_blade"
    return "blockdiag"


def mvlinear_prepare_params(weight, bias, subspaces, *, compute_dtype=jnp.bfloat16,
                            mode="auto", lane_multiple=128):
    """Build the matmul-ready weight/bias layouts.

    weight:    (N, M, n_subspaces) float32
    bias:      (1, N, 1) float32, or None
    subspaces: static per-grade blade counts, sum == D
    Returns a dict consumed by mvlinear_forward (reuse across forward calls).
    """
    N, M, n_sub = weight.shape
    subspaces = np.asarray(subspaces)
    D = int(subspaces.sum())
    assert len(subspaces) == n_sub
    if mode == "auto":
        mode = mvlinear_choose_mode(M, N, D)
    assert mode in ("per_blade", "blockdiag")

    # torch.repeat_interleave(weight, subspaces, dim=-1): (N, M, D), in f32.
    comp = np.repeat(np.arange(n_sub), subspaces)
    w_exp = jnp.asarray(weight, jnp.float32)[:, :, comp]          # (N, M, D)

    if bias is not None:
        b_vec = jnp.asarray(bias, jnp.float32).reshape(N)
    else:
        b_vec = jnp.zeros((N,), jnp.float32)

    if mode == "per_blade":
        # Per-blade dense weights: w[i, m, n] = w_exp[n, m, i]; N padded to
        # a lane-dense multiple of 128.
        n_pad = _round_up(N, lane_multiple)
        w_bl = jnp.transpose(w_exp, (2, 1, 0))                    # (D, M, N)
        w_bl = jnp.pad(w_bl, ((0, 0), (0, 0), (0, n_pad - N))).astype(compute_dtype)
        # algebra.embed(bias, (0,)): bias lives only on the scalar blade (d=0).
        b_bl = jnp.zeros((D, 1, n_pad), jnp.float32)
        b_bl = b_bl.at[0, 0, :N].set(b_vec)
        return dict(mode=mode, w=w_bl, b=b_bl, N=N, M=M, D=D)

    # Block-diagonal weight via direct scatter (no dense einsum intermediate):
    # Wmat[(m,i),(n,j)] = w_exp[n,m,i] * (i == j)
    blades = jnp.arange(D)
    w_mat = jnp.zeros((M, D, N, D), jnp.float32)
    w_mat = w_mat.at[:, blades, :, blades].set(jnp.transpose(w_exp, (2, 1, 0)))
    w_mat = w_mat.reshape(M * D, N * D)
    cols_pad = _round_up(N * D, lane_multiple)
    w_mat = jnp.pad(w_mat, ((0, 0), (0, cols_pad - N * D))).astype(compute_dtype)
    b_emb = jnp.zeros((N, D), jnp.float32).at[:, 0].set(b_vec)
    b_row = jnp.pad(b_emb.reshape(1, N * D), ((0, 0), (0, cols_pad - N * D)))
    return dict(mode=mode, w=w_mat, b=b_row, N=N, M=M, D=D)


# --------------------------------------------------------------------------- #
# Forward
# --------------------------------------------------------------------------- #
def mvlinear_forward(x, params, *, row_block=512, col_block=1024,
                     out_dtype=None, extra_buffering=False):
    """Pallas MVLinear forward (subspaces=True).

    x:      (B, M, S, D) multivector features ('bm...i' with one ... axis)
    params: output of mvlinear_prepare_params
    Returns (B, N, S, D) in out_dtype (default: x.dtype).
    """
    mode, w, b = params["mode"], params["w"], params["b"]
    N, M, D = params["N"], params["M"], params["D"]
    B, Mx, S, Dx = x.shape
    assert (Mx, Dx) == (M, D), f"x shape {x.shape} does not match (M={M}, D={D})"
    out_dtype = x.dtype if out_dtype is None else out_dtype
    compute_dtype = w.dtype

    rows = B * S
    K = M if mode == "per_blade" else M * D
    cols_pad = w.shape[-1]
    sub = _sublane_multiple(compute_dtype)
    in_item = np.dtype(compute_dtype).itemsize
    out_item = np.dtype(out_dtype).itemsize
    budget = _vmem_budget_bytes()

    # ---- tile selection ----------------------------------------------------
    rb = max(sub, min(_round_up(row_block, sub), _round_up(rows, sub)))
    # Prefer keeping the whole (padded) weight resident as ONE column tile so
    # it is DMA'd once per (blade,) column, never re-streamed per row tile.
    if 2 * K * cols_pad * in_item <= budget // 2:
        cb = cols_pad
    else:
        cb = min(cols_pad, max(128, _round_up(col_block, 128)))

    def _bytes_needed(rb_, cb_):
        return (2 * rb_ * K * in_item        # x (double-buffered)
                + 2 * K * cb_ * in_item      # weight
                + 2 * cb_ * 4                # bias (f32)
                + 2 * rb_ * cb_ * out_item   # output
                + rb_ * cb_ * 4)             # f32 accumulator / temporaries

    while _bytes_needed(rb, cb) > budget and rb > sub:
        rb = max(sub, _round_up(rb // 2, sub))
    while _bytes_needed(rb, cb) > budget and cb > 128:
        cb = max(128, _round_up(cb // 2, 128))

    n_row = _cdiv(rows, rb)
    n_col = _cdiv(cols_pad, cb)

    # v7x has 2 TensorCores: guarantee >= 2 parallel blocks when possible so
    # both cores get work (halve the row tile if the grid would be 1x1).
    n_parallel = n_row * n_col * (D if mode == "per_blade" else 1)
    if n_parallel == 1 and rows > sub:
        rb = min(rb, _round_up(_cdiv(rows, 2), sub))
        n_row = _cdiv(rows, rb)

    # Triple-buffer only the operand whose block index changes every inner
    # grid step (x); buffering the resident weight / output only burns VMEM.
    stream = {"pipeline_mode": pl.Buffered(3)} if extra_buffering else {}

    cparams = pltpu.CompilerParams(
        dimension_semantics=("parallel",) * (3 if mode == "per_blade" else 2),
        vmem_limit_bytes=int(budget),
    )

    if mode == "blockdiag":
        # TODO(synk): fold this relayout ((B,M,S,D) -> (B*S, M*D)) into the
        # kernel / accept a channels-minor layout upstream; for this mem-bound
        # layer it is the dominant extra HBM traffic.
        x2 = jnp.transpose(x, (0, 2, 1, 3)).reshape(rows, K).astype(compute_dtype)

        out2 = pl.pallas_call(
            _mvlinear_tile_kernel,
            out_shape=jax.ShapeDtypeStruct((rows, cols_pad), out_dtype),
            grid_spec=pltpu.PrefetchScalarGridSpec(
                num_scalar_prefetch=0,
                # columns OUTER, rows inner -> weight/bias block index constant
                # across the inner loop (weight DMA'd once per column tile).
                grid=(n_col, n_row),
                in_specs=[
                    pl.BlockSpec((rb, K), lambda c, r: (r, 0), **stream),
                    pl.BlockSpec((K, cb), lambda c, r: (0, c)),
                    pl.BlockSpec((1, cb), lambda c, r: (0, c)),
                ],
                out_specs=pl.BlockSpec((rb, cb), lambda c, r: (r, c)),
            ),
            compiler_params=cparams,
        )(x2, w, b)
        cols = N * D
        return out2[:, :cols].reshape(B, S, N, D).transpose(0, 2, 1, 3)

    # ---- per-blade path ------------------------------------------------------
    # TODO(synk): same relayout note; a blade-major (D, B, S, M) activation
    # layout upstream would remove this transpose entirely.
    xb = jnp.transpose(x, (3, 0, 2, 1)).reshape(D, rows, K).astype(compute_dtype)

    outb = pl.pallas_call(
        _mvlinear_tile_kernel,
        out_shape=jax.ShapeDtypeStruct((D, rows, cols_pad), out_dtype),
        grid_spec=pltpu.PrefetchScalarGridSpec(
            num_scalar_prefetch=0,
            # blade outermost, rows innermost: per-blade weight/bias tiles stay
            # resident across the whole inner row loop.
            grid=(D, n_col, n_row),
            in_specs=[
                pl.BlockSpec((None, rb, K), lambda d, c, r: (d, r, 0), **stream),
                pl.BlockSpec((None, K, cb), lambda d, c, r: (d, 0, c)),
                pl.BlockSpec((None, 1, cb), lambda d, c, r: (d, 0, c)),
            ],
            out_specs=pl.BlockSpec((None, rb, cb), lambda d, c, r: (d, r, c)),
        ),
        compiler_params=cparams,
    )(xb, w, b)
    return outb[:, :, :N].reshape(D, B, S, N).transpose(1, 3, 2, 0)


# --------------------------------------------------------------------------- #
# Pure-JAX reference mirroring the PyTorch forward
# --------------------------------------------------------------------------- #
def mvlinear_ref(x, weight, bias, subspaces):
    N = weight.shape[0]
    D = x.shape[-1]
    comp = np.repeat(np.arange(weight.shape[2]), np.asarray(subspaces))
    w_exp = weight[:, :, comp]                                   # (N, M, D)
    out = jnp.einsum('bmsi,nmi->bnsi', x, w_exp)
    if bias is not None:
        b_emb = jnp.zeros((1, N, 1, D), out.dtype).at[:, :, :, 0].set(bias)
        out = out + b_emb
    return out


if __name__ == "__main__":
    key = jax.random.PRNGKey(0)
    k1, k2, k3, k4, k5, k6 = jax.random.split(key, 6)

    # ---- small shapes: block-diagonal path selected automatically ----------
    B, M, N, S = 2, 4, 6, 8
    subspaces = (1, 3, 3, 1)          # Clifford algebra over R^3 -> 8 blades
    D = sum(subspaces)
    n_sub = len(subspaces)

    x = jax.random.normal(k1, (B, M, S, D), jnp.float32)
    weight = jax.random.normal(k2, (N, M, n_sub), jnp.float32) / math.sqrt(M)
    bias = jax.random.normal(k3, (1, N, 1), jnp.float32)
    ref = mvlinear_ref(x, weight, bias, subspaces)

    # f32 compute: tight numerical check of kernel math / layout (test-only
    # config on v5e/v6e, whose MXU is bf16-native).
    p32 = mvlinear_prepare_params(weight, bias, subspaces, compute_dtype=jnp.float32)
    assert p32["mode"] == "blockdiag"
    out32 = jax.block_until_ready(mvlinear_forward(x, p32))
    assert out32.shape == (B, N, S, D)
    np.testing.assert_allclose(np.asarray(out32), np.asarray(ref),
                               rtol=1e-5, atol=1e-5)

    # bf16 streaming + f32 accumulate (recommended production config).
    pbf = mvlinear_prepare_params(weight, bias, subspaces, compute_dtype=jnp.bfloat16)
    outbf = jax.block_until_ready(mvlinear_forward(x, pbf))
    np.testing.assert_allclose(np.asarray(outbf), np.asarray(ref),
                               rtol=1e-1, atol=1e-1)

    # Forced per-blade path at the same small shapes (tight f32 check).
    ppb = mvlinear_prepare_params(weight, bias, subspaces, compute_dtype=jnp.float32,
                                  mode="per_blade")
    outpb = jax.block_until_ready(mvlinear_forward(x, ppb))
    assert outpb.shape == (B, N, S, D)
    np.testing.assert_allclose(np.asarray(outpb), np.asarray(ref),
                               rtol=1e-5, atol=1e-5)

    # Larger channel count -> per-blade path selected automatically; also
    # exercises the bf16 output-dtype option.
    B2, M2, N2, S2 = 2, 64, 64, 64
    x2 = jax.random.normal(k4, (B2, M2, S2, D), jnp.float32)
    w2 = jax.random.normal(k5, (N2, M2, n_sub), jnp.float32) / math.sqrt(M2)
    b2 = jax.random.normal(k6, (1, N2, 1), jnp.float32)
    ref2 = mvlinear_ref(x2, w2, b2, subspaces)
    p2 = mvlinear_prepare_params(w2, b2, subspaces, compute_dtype=jnp.bfloat16)
    assert p2["mode"] == "per_blade"
    out2 = jax.block_until_ready(
        mvlinear_forward(x2, p2, out_dtype=jnp.bfloat16))
    assert out2.shape == (B2, N2, S2, D)
    np.testing.assert_allclose(np.asarray(out2, np.float32), np.asarray(ref2),
                               rtol=1e-1, atol=1e-1)

    print("KERNEL_OK")
</pallas_src>

<mosaic_0001>
module attributes {stable_mosaic.version = 11 : i64} {
  func.func @_mvlinear_tile_kernel(%arg0: i32, %arg1: i32, %arg2: memref<8x32xf32, #tpu.memory_space<vmem>>, %arg3: memref<32x128xf32, #tpu.memory_space<vmem>>, %arg4: memref<1x128xf32, #tpu.memory_space<vmem>>, %arg5: memref<8x128xf32, #tpu.memory_space<vmem>>) attributes {dimension_semantics = [#tpu.dimension_semantics<parallel>, #tpu.dimension_semantics<parallel>], iteration_bounds = array<i64: 1, 2>, scalar_prefetch = 0 : i64, scratch_operands = 0 : i64, tpu.core_type = #tpu.core_type<tc>, window_params = [{transform_indices = @transform_0, window_bounds = array<i64: 8, 32>}, {transform_indices = @transform_1, window_bounds = array<i64: 32, 128>}, {transform_indices = @transform_2, window_bounds = array<i64: 1, 128>}, {transform_indices = @transform_3, window_bounds = array<i64: 8, 128>}]} {
    %c0 = arith.constant 0 : index
    %c0_0 = arith.constant 0 : index
    %0 = vector.load %arg2[%c0, %c0_0] : memref<8x32xf32, #tpu.memory_space<vmem>>, vector<8x32xf32>
    %c0_1 = arith.constant 0 : index
    %c0_2 = arith.constant 0 : index
    %1 = vector.load %arg3[%c0_1, %c0_2] : memref<32x128xf32, #tpu.memory_space<vmem>>, vector<32x128xf32>
    %cst = arith.constant dense<0.000000e+00> : vector<8x128xf32>
    %2 = tpu.matmul %0, %1, %cst {dimension_numbers = #tpu.dot_dimension_numbers<[1], [0], [0], [1], [0, 0, 1, 1], [], []>} : vector<8x32xf32>, vector<32x128xf32>, vector<8x128xf32> -> vector<8x128xf32>
    %c0_3 = arith.constant 0 : index
    %c0_4 = arith.constant 0 : index
    %3 = vector.load %arg4[%c0_3, %c0_4] : memref<1x128xf32, #tpu.memory_space<vmem>>, vector<1x128xf32>
    %4 = vector.broadcast %3 : vector<1x128xf32> to vector<8x128xf32>
    %5 = arith.addf %2, %4 : vector<8x128xf32>
    %c0_5 = arith.constant 0 : index
    %c0_6 = arith.constant 0 : index
    %6 = vector.load %arg5[%c0_5, %c0_6] : memref<8x128xf32, #tpu.memory_space<vmem>>, vector<8x128xf32>
    tpu.vector_store %arg5[%c0_5, %c0_6], %5 {strides = array<i32>} : memref<8x128xf32, #tpu.memory_space<vmem>>, vector<8x128xf32>,
    return
  }
  func.func @transform_0(%arg0: i32, %arg1: i32) -> (i32, i32) {
    %c0_i32 = arith.constant 0 : i32
    %c0_i32_0 = arith.constant 0 : i32
    return %arg1, %c0_i32 : i32, i32
  }
  func.func @transform_1(%arg0: i32, %arg1: i32) -> (i32, i32) {
    %c0_i32 = arith.constant 0 : i32
    %c0_i32_0 = arith.constant 0 : i32
    return %c0_i32, %arg0 : i32, i32
  }
  func.func @transform_2(%arg0: i32, %arg1: i32) -> (i32, i32) {
    %c0_i32 = arith.constant 0 : i32
    %c0_i32_0 = arith.constant 0 : i32
    return %c0_i32, %arg0 : i32, i32
  }
  func.func @transform_3(%arg0: i32, %arg1: i32) -> (i32, i32) {
    %c0_i32 = arith.constant 0 : i32
    return %arg1, %arg0 : i32, i32
  }
}

</mosaic_0001>

<bundles_post_ra>
// kernel: tpu_custom_call.1
= control target key start
LH: loop header
LB: loop body
LE: loop exit
PB: predicated region body
PF: predicated region fallthrough
CT: control target
= control target key end

     0   :  { %8 = vsyncpa [#allocation3], 0  ;;  %s804_s0 = inlined_call_operand.hbm [shape: f32[16,32], index: 0, kind: input, shape index: {}]   ;;  %s805_s1 = inlined_call_operand.hbm [shape: f32[32,128], index: 1, kind: input, shape index: {}]   ;;  %s806_s2 = inlined_call_operand.vmem [shape: f32[1,128], index: 2, kind: input, shape index: {}]   ;;  %s807_s3 = inlined_call_operand.hbm [shape: f32[16,128], index: 3, kind: output, shape index: {}]  }
   0x1   :  { %10 = vsyncpa [#allocation3 + $0x1], 0 }
   0x2   :  { %11 = vsyncpa [#allocation6], 0 }
   0x3   :  { %12 = vsyncpa [#allocation4], 0 }
   0x4   :  { %14 = vsyncpa [#allocation4 + $0x1], 0  ;;  %s658_s12 = smov 0   ;;  %s660_s13 = smov 0  }
   0x5   :  { %s662_s14 = smov 0   ;;  %s664_s15 = smov 0  }
   0x6   :  { %s666_s16 = smov 0   ;;  %s668_s17 = smov 0  }
   0x7 LB: > { %s394_s18 = sadd.s32 4294967295, %s633_s17   ;;  %p396_p0 = scmp.ge.s32.totalorder %s633_s17, 1  ;;  %s633_s17 = sphi %s668_s17, %s20_s17   ;;  %s629_s16 = sphi %s666_s16, %s818_s16   ;;  %s625_s15 = sphi %s664_s15, %s817_s15   ;;  %s621_s14 = sphi %s662_s14, %s816_s14   ;;  %s617_s13 = sphi %s660_s13, %s815_s13   ;;  %s613_s12 = sphi %s658_s12, %s814_s12  }
   0x8   : > { %p690_p1 = scmp.eq.s32.totalorder %s394_s18, 0  ;;  %p143_p2 = scmp.lt.s32.totalorder %s633_s17, 3 }
   0x9   : > { %s156_s22 = sshll.u32 %s805_s1, 4  ;;  %s635_s24 = smov [#allocation5]   ;;  %s157_s22 = int_to_ptr.hbm [resolvable:$true] %s156_s22 }
   0xa   : > { %p698_p3 = pnand %p396_p0, %p143_p2  ;;  %s158_s25 = sshll.u32 %s635_s24, 4  ;;  %s159_s25 = int_to_ptr.vmem [resolvable:$true] %s158_s25 }
   0xb   : > { %p399_p6 = scmp.ge.s32.totalorder %s633_s17, 2  ;;  %s636_s26 = smov 128  }
   0xc   : > { %p419_p4 = pneg %p698_p3  ;;  %s637_s27 = smov 8  }
   0xd   : > { %s395_s28 = sadd.s32 4294967294, %s633_s17   ;;  %s29_s29 = sadd.s32 1, %s629_s16 }
   0xe   : > { %p420_p5 = pnand %p419_p4, %p690_p1  ;;  %s39_s30 = sadd.s32 1, %s621_s14 }
   0xf   : > { %p30_p7 = scmp.ge.s32.totalorder %s29_s29, 2  ;;  %p46_p8 = scmp.ne.s32.totalorder %s621_s14, %s617_s13 }
  0x10   : > { %422 = dma.hbm_to_vmem [thread:$0]  (!%p420_p5), %s157_s22, 512, %s159_s25, [#allocation6], %s636_s26, %s636_s26, %s637_s27  }
  0x11   : > { %p47_p9 = scmp.eq.s32.totalorder %s633_s17, 0  ;;  %p52_p10 = scmp.ne.s32.totalorder %s617_s13, %s613_s12 }
  0x12   : > { %s820_s29 = smov (%p30_p7, %s29_s29), 0  ;;  %p130_p13 = scmp.eq.s32.totalorder %s394_s18, 1 }
  0x13   : > { %p717_p11 = por %p47_p9, %p46_p8  ;;  %p723_p12 = por %p690_p1, %p52_p10 }
  0x14   : > { %s36_s6 = ssub.s32 %s629_s16, %s820_s29  ;;  %p136_p2 = scmp.eq.s32.totalorder %s395_s28, 1 }
  0x15   : > { %p37_p0 = scmp.eq.s32.totalorder %s36_s6, 0  ;;  %p729_p4 = por %p130_p13, %p46_p8 }
  0x16   : > { %p432_p5 = scmp.lt.s32.totalorder %s633_s17, 2  ;;  %p737_p7 = por %p136_p2, %p52_p10 }
  0x17   : > { %s735_s8 = scalar_select %p37_p0, %s621_s14, %s39_s30  }
  0x18   : > { %s178_s10 = sand.u32 1, %s621_s14   ;;  %s401_s20 = sshll.u32 %s629_s16, 3 }
  0x19   : > { %s400_s11 = sshll.u32 %s178_s10, 3  ;;  %s186_s18 = scalar_lea.hbm %s804_s0, %s401_s20 }
  0x1a   : > { %s182_s24 = scalar_lea.vmem [#allocation2], %s400_s11  ;;  %s188_s26 = sshll.u32 %s186_s18, 4  ;;  %s189_s26 = int_to_ptr.hbm [resolvable:$true] %s188_s26 }
  0x1b   : > { %s190_s25 = sshll.u32 %s182_s24, 4  ;;  %p424_p8 = pnand %p432_p5, %p717_p11  ;;  %s191_s25 = int_to_ptr.vmem [resolvable:$true] %s190_s25 }
  0x1c   : > { %s179_s27 = scalar_lea.sflag [#allocation3], %s178_s10  ;;  %199 = sbr.rel (%p698_p3) target bundleno = 175 (0xaf), region = 32 }
  0x1d   : > { %426 = dma.hbm_to_vmem [thread:$0]  (!%p424_p8), %s189_s26, 128, %s191_s25, %s179_s27  }
  0x1e   : > { %s751_s28 = sand.u32 (!%p698_p3), 1, %s617_s13  }
  0x1f   : > { %s403_s30 = sshll.u32 (!%p698_p3), %s751_s28, 3  ;;  %s202_s6 = scalar_lea.sflag (!%p698_p3), [#allocation3], %s751_s28 }
  0x20   : > { %s205_s11 = scalar_lea.vmem (!%p698_p3), [#allocation2], %s403_s30 }
  0x21   : > { %600 = dma.done.wait (%p723_p12), %s202_s6, 128  }
  0x22   : > { %602 = vsyncadd (%p723_p12), %s202_s6, 4294967168 }
  0x23   : > { %604 = dma.done.wait (%p690_p1), [#allocation6], 512  }
  0x24   : > { %606 = vsyncadd (%p690_p1), [#allocation6], 4294966784  ;;  %v244_v0 = vld [vmem:[#allocation5 + $0x18] sm:$0xff]  ;;  %v243_v1 = vld [vmem:[#allocation5 + $0x10] sm:$0xff]  ;;  %vm249_vm0 = vcmask 261120   ;;  %s408_s23 = sshll.u32 %s625_s15, 3 }
  0x25   : > { %265 = vmatpush.msra.mxu0 %v244_v0  ;;  %v242_v2 = vld [vmem:[#allocation5 + $0x8] sm:$0xff]  ;;  %v241_v3 = vld [vmem:[#allocation5] sm:$0xff]  ;;  %v240_v4 = vld [vmem:[%s205_s11] sm:$0xff]  ;;  %s286_s19 = scalar_lea.hbm %s807_s3, %s408_s23  ;;  %s236_s21 = scalar_lea.vmem [#allocation7], %s403_s30 }
  0x26   : > { %v486_v5 = vld [vmem:[%s806_s2] ss:$0 sm:$0xff]  ;;  %s288_s22 = sshll.u32 %s236_s21, 4  ;;  %s290_s18 = sshll.u32 %s286_s19, 4  ;;  %s289_s22 = int_to_ptr.vmem [resolvable:$true] %s288_s22  ;;  %s291_s18 = int_to_ptr.hbm [resolvable:$true] %s290_s18 }
  0x27   : > { %266 = vmatpush.msra.mxu0 %v243_v1  ;;  %s275_s24 = scalar_lea.sflag [#allocation4], %s751_s28  ;;  %s561_s25 = sshra.s32 %s291_s18, 4  ;;  %s562_s25 = int_to_ptr.hbm [resolvable:$true] %s561_s25 }
  0x28   : > { %s563_s15 = scalar_lea.hbm %s562_s25, 8  ;;  %s567_s6 = scalar_lea.hbm %s807_s3, 16 }
  0x29   : > { %267 = vmatpush.msra.mxu0 %v242_v2  ;;  %p564_p1 = scmp.ne.s32.totalorder %s562_s25, %s563_s15  ;;  %p568_p10 = scmp.lt.s32.totalorder %s562_s25, %s807_s3 }
  0x2a   : > { %p569_p11 = scmp.lt.s32.totalorder %s567_s6, %s563_s15 }
  0x2b   : > { %268 = vmatpush.msra.mxu0 %v241_v3  ;;  %p565_p3 = pnand %p564_p1, %p729_p4 }
  0x2c   : > { %406 = vmatmul.msk.f32.vlgmr.msra.gmra.mxu0 %vm249_vm0, %v240_v4  ;;  %p570_p12 = por %p569_p11, %p568_p10 }
  0x2d   : > { %p566_p9 = pneg %p565_p3 }
  0x2f   : > { %p571_p13 = pnand %p570_p12, %p566_p9 }
  0xa9   : > { %v270_v6 = vpop.f32.mrf.mxu0 }
  0xaa   : > { %v271_v7 = vadd.f32 %v486_v5, %v270_v6 }
  0xac   : > { %273 = vst [vmem:[%s236_s21] sm:$0xff] %v271_v7 }
  0xad   : > { %574 = shalt.err (!%p571_p13)
}
  0xae   : > { %417 = dma.vmem_to_hbm [thread:$0]  (%p729_p4), %s289_s22, 128, %s291_s18, %s275_s24  }
  0xaf PF: > { %s302_s28 = sand.u32 1, %s613_s12   ;;  %p428_p0 = pnand %p399_p6, %p737_p7 }
  0xb0   : > { %s303_s23 = scalar_lea.sflag [#allocation4], %s302_s28 }
  0xb1   : > { %p429_p2 = pneg %p428_p0 }
  0xb3   : > { %608 = dma.done.wait (%p429_p2), %s303_s23, 128  }
  0xb4   : > { %610 = vsyncadd (%p429_p2), %s303_s23, 4294967168  ;;  %s20_s17 = sadd.s32 1, %s633_s17   ;;  %s814_s12 = smov %s617_s13 }
  0xb5   : > { %p17_p5 = scmp.ge.s32.totalorder %s20_s17, 4   ;;  %s815_s13 = smov %s621_s14 }
  0xb6   : > { %s816_s14 = smov %s735_s8  ;;  %s817_s15 = smov %s629_s16 }
  0xb7   : > { %s818_s16 = smov %s820_s29  ;;  %19 = sbr.rel (!%p17_p5) target bundleno = 7 (0x7), region = 85 }
  0xbc   :  { %309 = vsyncpa [#allocation3], 1 }
  0xbd   :  { %311 = vsyncpa [#allocation3 + $0x1], 1 }
  0xbe   :  { %312 = vsyncpa [#allocation6], 1 }
  0xbf   :  { %313 = vsyncpa [#allocation4], 1 }
  0xc0   :  { %315 = vsyncpa [#allocation4 + $0x1], 1 }

</bundles_post_ra>
